<compile_context>
chip_gen: v6e
topology: v6e:2x2x1
jax: 0.10.0
libtpu: 0.0.40
codegen_flags: <defaults>
</compile_context>

<pallas_src>
import jax
import jax.numpy as jnp
from jax.experimental import pallas as pl
from jax.experimental.pallas import tpu as pltpu


def mlp_diffusion_kernel(x_ref, t_ref, r0_ref, r1_ref, r2_ref, w3_ref, b3_ref,
                         o_ref):
    # x: [TB, 8] bf16, t: [TB, 1] int32, r*: fused bf16 RHS slabs, b3: f32.
    x = x_ref[...]                                    # [TB, 8] bf16
    t = t_ref[...]                                    # [TB, 1] int32

    tb = x_ref.shape[0]
    in_dim = x_ref.shape[1]
    n_pad = r0_ref.shape[0] - in_dim                  # padded step-axis length

    # One-hot of t over the (padded) step axis; bf16 0/1 values make the
    # fused MXU gather exact for bf16 table entries.
    iota = jax.lax.broadcasted_iota(jnp.int32, (tb, n_pad), 1)
    onehot = (iota == t).astype(jnp.bfloat16)         # [TB, n_pad]

    # block 0: [onehot | x] @ [emb0+b0 ; w0]  (== x@w0 + b0 + emb0[t]) -> ReLU
    lhs0 = jnp.concatenate([onehot, x], axis=1)       # [TB, n_pad + 8]
    h = jnp.dot(lhs0, r0_ref[...], preferred_element_type=jnp.float32)
    h = jnp.maximum(h, 0.0).astype(jnp.bfloat16)

    # block 1: [h | onehot] @ [w1 ; emb1+b1]  -> ReLU   (K = U + n_pad = 256)
    lhs1 = jnp.concatenate([h, onehot], axis=1)
    h = jnp.dot(lhs1, r1_ref[...], preferred_element_type=jnp.float32)
    h = jnp.maximum(h, 0.0).astype(jnp.bfloat16)

    # block 2: [h | onehot] @ [w2 ; emb2+b2]  -> ReLU
    lhs2 = jnp.concatenate([h, onehot], axis=1)
    h = jnp.dot(lhs2, r2_ref[...], preferred_element_type=jnp.float32)
    h = jnp.maximum(h, 0.0).astype(jnp.bfloat16)

    # output: Linear(U, 8) + b3
    out = jnp.dot(h, w3_ref[...], preferred_element_type=jnp.float32) + b3_ref[...]
    o_ref[...] = out.astype(o_ref.dtype)


def _round_up(n, m):
    return ((n + m - 1) // m) * m


def mlp_diffusion_forward(x, t, params, *, block_b=2048):
    """x: [B, 8] float32, t: [B] int32, params: dict of weights -> [B, 8] f32."""
    B, D = x.shape
    U = params["w0"].shape[1]
    n_steps = params["emb0"].shape[0]

    # --- parameter prep (cheap, cacheable under jit) ---------------------
    # bf16 weights (MXU-native), biases b0/b1/b2 folded into the embedding
    # tables, step axis padded to a multiple of 128 so the fused one-hot
    # contraction sits on a lane boundary.
    n_pad = _round_up(n_steps, 128)

    def fused_table(emb, b):
        tbl = (emb + b).astype(jnp.bfloat16)          # [n_steps, U]
        return jnp.pad(tbl, ((0, n_pad - n_steps), (0, 0)))

    e0 = fused_table(params["emb0"], params["b0"])
    e1 = fused_table(params["emb1"], params["b1"])
    e2 = fused_table(params["emb2"], params["b2"])
    w0 = params["w0"].astype(jnp.bfloat16)
    w1 = params["w1"].astype(jnp.bfloat16)
    w2 = params["w2"].astype(jnp.bfloat16)
    w3 = params["w3"].astype(jnp.bfloat16)
    b3 = params["b3"].astype(jnp.float32)

    # Fused RHS slabs (one matmul per hidden layer).
    r0 = jnp.concatenate([e0, w0], axis=0)            # [(n_pad + D), U]
    r1 = jnp.concatenate([w1, e1], axis=0)            # [(U + n_pad), U]
    r2 = jnp.concatenate([w2, e2], axis=0)            # [(U + n_pad), U]

    # --- batch tiling ------------------------------------------------------
    B8 = _round_up(B, 8)
    tb = min(block_b, B8)                  # don't pad small batches to a block
    if B8 // tb < 2 and B8 >= 16:          # give v7x's 2 TCs >= 2 grid steps
        tb = _round_up(-(-B8 // 2), 8)
    Bp = _round_up(B8, tb)

    xp = jnp.pad(x.astype(jnp.bfloat16), ((0, Bp - B), (0, 0)))
    tp = jnp.pad(t.astype(jnp.int32), (0, Bp - B)).reshape(Bp, 1)

    grid = (Bp // tb,)

    def batch_spec(cols):
        return pl.BlockSpec((tb, cols), lambda i: (i, 0))

    def const_spec(shape):
        return pl.BlockSpec(shape, lambda i: (0, 0))

    # Advisory cost hint for the XLA scheduler.
    flops = 2 * Bp * ((n_pad + D) * U + 2 * (U + n_pad) * U + U * D)
    bytes_accessed = (
        Bp * D * 2 + Bp * 4 + Bp * D * 4            # x (bf16), t, out (f32)
        + (r0.size + r1.size + r2.size + w3.size) * 2 + b3.size * 4)
    cost = pl.CostEstimate(flops=flops, transcendentals=0,
                           bytes_accessed=bytes_accessed)

    out = pl.pallas_call(
        mlp_diffusion_kernel,
        out_shape=jax.ShapeDtypeStruct((Bp, D), jnp.float32),
        grid=grid,
        in_specs=[
            batch_spec(D),                  # x
            batch_spec(1),                  # t
            const_spec((n_pad + D, U)),     # [emb0+b0 ; w0]  (VMEM-resident)
            const_spec((U + n_pad, U)),     # [w1 ; emb1+b1]
            const_spec((U + n_pad, U)),     # [w2 ; emb2+b2]
            const_spec((U, D)),             # w3
            const_spec((1, D)),             # b3
        ],
        out_specs=batch_spec(D),
        compiler_params=pltpu.CompilerParams(
            dimension_semantics=("parallel",)),
        cost_estimate=cost,
    )(xp, tp, r0, r1, r2, w3, b3)

    return out[:B]


def make_params(key, n_steps, num_units=128, in_dim=8):
    """Deterministic parameter init (PyTorch-like uniform(-1/sqrt(fan_in), ...))."""
    ks = jax.random.split(key, 11)

    def lin(kw, kb, fan_in, fan_out):
        bound = 1.0 / jnp.sqrt(fan_in)
        w = jax.random.uniform(kw, (fan_in, fan_out), jnp.float32, -bound, bound)
        b = jax.random.uniform(kb, (1, fan_out), jnp.float32, -bound, bound)
        return w, b

    w0, b0 = lin(ks[0], ks[1], in_dim, num_units)
    w1, b1 = lin(ks[2], ks[3], num_units, num_units)
    w2, b2 = lin(ks[4], ks[5], num_units, num_units)
    w3, b3 = lin(ks[6], ks[7], num_units, in_dim)

    emb0 = jax.random.normal(ks[8], (n_steps, num_units), jnp.float32)
    emb1 = jax.random.normal(ks[9], (n_steps, num_units), jnp.float32)
    emb2 = jax.random.normal(ks[10], (n_steps, num_units), jnp.float32)

    return dict(w0=w0, b0=b0, w1=w1, b1=b1, w2=w2, b2=b2, w3=w3, b3=b3,
                emb0=emb0, emb1=emb1, emb2=emb2)


def reference_forward(x, t, params):
    """Pure-JAX f32 reference mirroring the PyTorch forward."""
    h = x
    for w, b, e in [(params["w0"], params["b0"], params["emb0"]),
                    (params["w1"], params["b1"], params["emb1"]),
                    (params["w2"], params["b2"], params["emb2"])]:
        h = h @ w + b
        h = h + e[t]
        h = jnp.maximum(h, 0.0)
    return h @ params["w3"] + params["b3"]


if __name__ == "__main__":
    key = jax.random.PRNGKey(0)
    kx, kt, kp = jax.random.split(key, 3)

    B, D = 8, 8
    n_steps, num_units = 100, 128

    x = jax.random.normal(kx, (B, D), jnp.float32)
    t = jax.random.randint(kt, (B,), 0, n_steps, jnp.int32)
    params = make_params(kp, n_steps, num_units, D)

    out = mlp_diffusion_forward(x, t, params)
    out = jax.block_until_ready(out)

    ref = reference_forward(x, t, params)
    assert out.shape == (B, D)
    # bf16 operands (f32 accumulation) -> loosened tolerance vs. f32 reference.
    assert jnp.allclose(out, ref, atol=2e-2, rtol=2e-2), "mismatch vs reference"

    # Also exercise a multi-block batch path (grid > 1, megacore-shardable).
    B2 = 40
    x2 = jax.random.normal(kx, (B2, D), jnp.float32)
    t2 = jax.random.randint(kt, (B2,), 0, n_steps, jnp.int32)
    out2 = jax.block_until_ready(mlp_diffusion_forward(x2, t2, params))
    ref2 = reference_forward(x2, t2, params)
    assert out2.shape == (B2, D)
    assert jnp.allclose(out2, ref2, atol=2e-2, rtol=2e-2), "mismatch (multi-block)"

    print("KERNEL_OK")
</pallas_src>

<mosaic_0001>
module attributes {stable_mosaic.version = 11 : i64} {
  func.func @mlp_diffusion_kernel(%arg0: i32, %arg1: memref<8x8xbf16, #tpu.memory_space<vmem>>, %arg2: memref<8x1xi32, #tpu.memory_space<vmem>>, %arg3: memref<136x128xbf16, #tpu.memory_space<vmem>>, %arg4: memref<256x128xbf16, #tpu.memory_space<vmem>>, %arg5: memref<256x128xbf16, #tpu.memory_space<vmem>>, %arg6: memref<128x8xbf16, #tpu.memory_space<vmem>>, %arg7: memref<1x8xf32, #tpu.memory_space<vmem>>, %arg8: memref<8x8xf32, #tpu.memory_space<vmem>>) attributes {dimension_semantics = [#tpu.dimension_semantics<parallel>], iteration_bounds = array<i64: 1>, scalar_prefetch = 0 : i64, scratch_operands = 0 : i64, tpu.core_type = #tpu.core_type<tc>, window_params = [{transform_indices = @transform_0, window_bounds = array<i64: 8, 8>}, {transform_indices = @transform_1, window_bounds = array<i64: 8, 1>}, {pipeline_mode = #tpu.pipeline_mode<synchronous>, transform_indices = @transform_2, window_bounds = array<i64: 136, 128>}, {pipeline_mode = #tpu.pipeline_mode<synchronous>, transform_indices = @transform_3, window_bounds = array<i64: 256, 128>}, {pipeline_mode = #tpu.pipeline_mode<synchronous>, transform_indices = @transform_4, window_bounds = array<i64: 256, 128>}, {pipeline_mode = #tpu.pipeline_mode<synchronous>, transform_indices = @transform_5, window_bounds = array<i64: 128, 8>}, {pipeline_mode = #tpu.pipeline_mode<synchronous>, transform_indices = @transform_6, window_bounds = array<i64: 1, 8>}, {transform_indices = @transform_7, window_bounds = array<i64: 8, 8>}]} {
    %c0 = arith.constant 0 : index
    %c0_0 = arith.constant 0 : index
    %0 = vector.load %arg1[%c0, %c0_0] : memref<8x8xbf16, #tpu.memory_space<vmem>>, vector<8x8xbf16>
    %c0_1 = arith.constant 0 : index
    %c0_2 = arith.constant 0 : index
    %1 = vector.load %arg2[%c0_1, %c0_2] : memref<8x1xi32, #tpu.memory_space<vmem>>, vector<8x1xi32>
    %2 = tpu.iota {dimensions = array<i32: 1>} : vector<8x128xi32>
    %3 = vector.broadcast %1 : vector<8x1xi32> to vector<8x128xi32>
    %4 = arith.cmpi eq, %2, %3 : vector<8x128xi32>
    %5 = arith.extui %4 : vector<8x128xi1> to vector<8x128xi32>
    %6 = arith.sitofp %5 : vector<8x128xi32> to vector<8x128xf32>
    %7 = arith.truncf %6 : vector<8x128xf32> to vector<8x128xbf16>
    %8 = tpu.concatenate %7, %0 in 1 : vector<8x128xbf16>, vector<8x8xbf16> -> vector<8x136xbf16>
    %c0_3 = arith.constant 0 : index
    %c0_4 = arith.constant 0 : index
    %9 = vector.load %arg3[%c0_3, %c0_4] : memref<136x128xbf16, #tpu.memory_space<vmem>>, vector<136x128xbf16>
    %cst = arith.constant dense<0.000000e+00> : vector<8x128xf32>
    %10 = tpu.matmul %8, %9, %cst {dimension_numbers = #tpu.dot_dimension_numbers<[1], [0], [0], [1], [0, 0, 1, 1], [], []>} : vector<8x136xbf16>, vector<136x128xbf16>, vector<8x128xf32> -> vector<8x128xf32>
    %cst_5 = arith.constant 0.000000e+00 : f32
    %11 = vector.broadcast %cst_5 : f32 to vector<8x128xf32>
    %12 = arith.maximumf %10, %11 : vector<8x128xf32>
    %13 = arith.truncf %12 : vector<8x128xf32> to vector<8x128xbf16>
    %14 = tpu.concatenate %13, %7 in 1 : vector<8x128xbf16>, vector<8x128xbf16> -> vector<8x256xbf16>
    %c0_6 = arith.constant 0 : index
    %c0_7 = arith.constant 0 : index
    %15 = vector.load %arg4[%c0_6, %c0_7] : memref<256x128xbf16, #tpu.memory_space<vmem>>, vector<256x128xbf16>
    %cst_8 = arith.constant dense<0.000000e+00> : vector<8x128xf32>
    %16 = tpu.matmul %14, %15, %cst_8 {dimension_numbers = #tpu.dot_dimension_numbers<[1], [0], [0], [1], [0, 0, 1, 1], [], []>} : vector<8x256xbf16>, vector<256x128xbf16>, vector<8x128xf32> -> vector<8x128xf32>
    %cst_9 = arith.constant 0.000000e+00 : f32
    %17 = vector.broadcast %cst_9 : f32 to vector<8x128xf32>
    %18 = arith.maximumf %16, %17 : vector<8x128xf32>
    %19 = arith.truncf %18 : vector<8x128xf32> to vector<8x128xbf16>
    %20 = tpu.concatenate %19, %7 in 1 : vector<8x128xbf16>, vector<8x128xbf16> -> vector<8x256xbf16>
    %c0_10 = arith.constant 0 : index
    %c0_11 = arith.constant 0 : index
    %21 = vector.load %arg5[%c0_10, %c0_11] : memref<256x128xbf16, #tpu.memory_space<vmem>>, vector<256x128xbf16>
    %cst_12 = arith.constant dense<0.000000e+00> : vector<8x128xf32>
    %22 = tpu.matmul %20, %21, %cst_12 {dimension_numbers = #tpu.dot_dimension_numbers<[1], [0], [0], [1], [0, 0, 1, 1], [], []>} : vector<8x256xbf16>, vector<256x128xbf16>, vector<8x128xf32> -> vector<8x128xf32>
    %cst_13 = arith.constant 0.000000e+00 : f32
    %23 = vector.broadcast %cst_13 : f32 to vector<8x128xf32>
    %24 = arith.maximumf %22, %23 : vector<8x128xf32>
    %25 = arith.truncf %24 : vector<8x128xf32> to vector<8x128xbf16>
    %c0_14 = arith.constant 0 : index
    %c0_15 = arith.constant 0 : index
    %26 = vector.load %arg6[%c0_14, %c0_15] : memref<128x8xbf16, #tpu.memory_space<vmem>>, vector<128x8xbf16>
    %cst_16 = arith.constant dense<0.000000e+00> : vector<8x8xf32>
    %27 = tpu.matmul %25, %26, %cst_16 {dimension_numbers = #tpu.dot_dimension_numbers<[1], [0], [0], [1], [0, 0, 1, 1], [], []>} : vector<8x128xbf16>, vector<128x8xbf16>, vector<8x8xf32> -> vector<8x8xf32>
    %c0_17 = arith.constant 0 : index
    %c0_18 = arith.constant 0 : index
    %28 = vector.load %arg7[%c0_17, %c0_18] : memref<1x8xf32, #tpu.memory_space<vmem>>, vector<1x8xf32>
    %29 = vector.broadcast %28 : vector<1x8xf32> to vector<8x8xf32>
    %30 = arith.addf %27, %29 : vector<8x8xf32>
    %c0_19 = arith.constant 0 : index
    %c0_20 = arith.constant 0 : index
    %31 = vector.load %arg8[%c0_19, %c0_20] : memref<8x8xf32, #tpu.memory_space<vmem>>, vector<8x8xf32>
    tpu.vector_store %arg8[%c0_19, %c0_20], %30 {strides = array<i32>} : memref<8x8xf32, #tpu.memory_space<vmem>>, vector<8x8xf32>,
    return
  }
  func.func @transform_0(%arg0: i32) -> (i32, i32) {
    %c0_i32 = arith.constant 0 : i32
    %c0_i32_0 = arith.constant 0 : i32
    return %arg0, %c0_i32 : i32, i32
  }
  func.func @transform_1(%arg0: i32) -> (i32, i32) {
    %c0_i32 = arith.constant 0 : i32
    %c0_i32_0 = arith.constant 0 : i32
    return %arg0, %c0_i32 : i32, i32
  }
  func.func @transform_2(%arg0: i32) -> (i32, i32) {
    %c0_i32 = arith.constant 0 : i32
    %c0_i32_0 = arith.constant 0 : i32
    %c0_i32_1 = arith.constant 0 : i32
    return %c0_i32, %c0_i32_0 : i32, i32
  }
  func.func @transform_3(%arg0: i32) -> (i32, i32) {
    %c0_i32 = arith.constant 0 : i32
    %c0_i32_0 = arith.constant 0 : i32
    %c0_i32_1 = arith.constant 0 : i32
    return %c0_i32, %c0_i32_0 : i32, i32
  }
  func.func @transform_4(%arg0: i32) -> (i32, i32) {
    %c0_i32 = arith.constant 0 : i32
    %c0_i32_0 = arith.constant 0 : i32
    %c0_i32_1 = arith.constant 0 : i32
    return %c0_i32, %c0_i32_0 : i32, i32
  }
  func.func @transform_5(%arg0: i32) -> (i32, i32) {
    %c0_i32 = arith.constant 0 : i32
    %c0_i32_0 = arith.constant 0 : i32
    %c0_i32_1 = arith.constant 0 : i32
    return %c0_i32, %c0_i32_0 : i32, i32
  }
  func.func @transform_6(%arg0: i32) -> (i32, i32) {
    %c0_i32 = arith.constant 0 : i32
    %c0_i32_0 = arith.constant 0 : i32
    %c0_i32_1 = arith.constant 0 : i32
    return %c0_i32, %c0_i32_0 : i32, i32
  }
  func.func @transform_7(%arg0: i32) -> (i32, i32) {
    %c0_i32 = arith.constant 0 : i32
    %c0_i32_0 = arith.constant 0 : i32
    return %arg0, %c0_i32 : i32, i32
  }
}

</mosaic_0001>

<bundles_post_ra>
// kernel: tpu_custom_call.1
= control target key start
LH: loop header
LB: loop body
LE: loop exit
PB: predicated region body
PF: predicated region fallthrough
CT: control target
= control target key end

     0   :  { %12 = vsyncpa [#allocation3], 0  ;;  %s1039_s0 = inlined_call_operand.vmem [shape: bf16[8,8], index: 0, kind: input, shape index: {}]   ;;  %s1040_s1 = inlined_call_operand.vmem [shape: s32[8,1], index: 1, kind: input, shape index: {}]   ;;  %s1041_s2 = inlined_call_operand.vmem [shape: bf16[136,128], index: 2, kind: input, shape index: {}]   ;;  %s1042_s3 = inlined_call_operand.hbm [shape: bf16[256,128], index: 3, kind: input, shape index: {}]   ;;  %s1043_s4 = inlined_call_operand.hbm [shape: bf16[256,128], index: 4, kind: input, shape index: {}]   ;;  %s1044_s5 = inlined_call_operand.vmem [shape: bf16[128,8], index: 5, kind: input, shape index: {}]   ;;  %s1045_s6 = inlined_call_operand.vmem [shape: f32[1,8], index: 6, kind: input, shape index: {}]   ;;  %s1046_s7 = inlined_call_operand.hbm [shape: f32[8,8], index: 7, kind: output, shape index: {}]  }
   0x1   :  { %13 = vsyncpa [#allocation6], 0 }
   0x2   :  { %14 = vsyncpa [#allocation4], 0  ;;  %s909_s24 = smov [#allocation2]  }
   0x3   :  { %s26_s25 = sshll.u32 %s909_s24, 4  ;;  %s27_s25 = int_to_ptr.vmem [resolvable:$true] %s26_s25 }
   0x4   :  { %s851_s26 = scalar_lea.vmem %s27_s25, 2048  ;;  %p856_p1 = scmp.lt.s32.totalorder %s27_s25, %s27_s25 }
   0x5   :  { %p852_p0 = scmp.ne.s32.totalorder %s27_s25, %s851_s26  ;;  %p857_p2 = scmp.lt.s32.totalorder %s851_s26, %s851_s26 }
   0x7   :  { %p858_p3 = por %p857_p2, %p856_p1 }
   0x9   :  { %p859_p4 = pnand %p858_p3, %p852_p0 }
   0xb   :  { %862 = shalt.err (!%p859_p4)
}
   0xc   :  { %s910_s27 = smov 64   ;;  %s911_s28 = smov 4  }
   0xd   :  { %32 = dma.hbm_to_vmem [thread:$0]  %s1042_s3, 2048, %s27_s25, [#allocation3], %s910_s27, %s910_s27, %s911_s28  }
   0xe   :  { %s912_s8 = smov [#allocation5]  }
   0xf   :  { %s38_s9 = sshll.u32 %s912_s8, 4  ;;  %s39_s9 = int_to_ptr.vmem [resolvable:$true] %s38_s9 }
  0x10   :  { %s871_s10 = scalar_lea.vmem %s39_s9, 2048  ;;  %p876_p6 = scmp.lt.s32.totalorder %s39_s9, %s39_s9 }
  0x11   :  { %p872_p5 = scmp.ne.s32.totalorder %s39_s9, %s871_s10  ;;  %p877_p7 = scmp.lt.s32.totalorder %s871_s10, %s871_s10 }
  0x13   :  { %p878_p8 = por %p877_p7, %p876_p6 }
  0x15   :  { %p879_p9 = pnand %p878_p8, %p872_p5 }
  0x17   :  { %882 = shalt.err (!%p879_p9)
}
  0x18   :  { %44 = dma.hbm_to_vmem [thread:$0]  %s1043_s4, 2048, %s39_s9, [#allocation6], %s910_s27, %s910_s27, %s911_s28  }
  0x19   :  { %903 = dma.done.wait [#allocation3], 2048  }
  0x1a   :  { %904 = vsyncadd [#allocation3], 4294965248 }
  0x1b   :  { %905 = dma.done.wait [#allocation6], 2048  }
  0x1c   :  { %906 = vsyncadd [#allocation6], 4294965248  ;;  %v913_v0 = vmov 0   ;;  %v57_v1 = vld [vmem:[%s1040_s1] sm:$0xff]  ;;  %v794_v2 = vld [vmem:[%s1041_s2 + $0x38] sm:$0xff]   ;;  %vm135_vm0 = vcmask 64512   ;;  %v58_v27 = vlaneseq }
  0x1d   :  { %793 = vset.pattern.permute.xlu0 %v913_v0  ;;  %143 = vmatprep.subr.bf16.mxu0 %v913_v0  ;;  %v795_v3 = vld [vmem:[%s1041_s2 + $0x30] sm:$0xff]   ;;  %v796_v4 = vld [vmem:[%s1041_s2 + $0x28] sm:$0xff]   ;;  %v797_v5 = vld [vmem:[%s1041_s2 + $0x20] sm:$0xff]   ;;  %vm139_vm1 = vcmask 1043456   ;;  %v914_v31 = vmov 1.0|1.0  }
  0x1e   :  { %61 = vperm.xlu0 %793, %v57_v1   ;;  %144 = vmatpush1.bf16.msra.mxu0 %v794_v2  ;;  %v56_v6 = vld [vmem:[%s1039_s0] sm:$0xf]  ;;  %v803_v7 = vld [vmem:[#allocation2 + $0x78] sm:$0xff]   ;;  %v805_v9 = vld [vmem:[#allocation2 + $0x70] sm:$0xff]   ;;  %v59_v28 = vand.u32 127, %v58_v27  ;;  %v915_v57 = vmov 0.0  }
  0x1f   :  { %145 = vmatprep.subr.bf16.mxu0 %v913_v0  ;;  %663 = vmatprep.mubr.msk.bf16.mxu0 %vm135_vm0, %v56_v6  ;;  %v804_v8 = vld [vmem:[#allocation2 + $0x38] sm:$0xff]   ;;  %v806_v10 = vld [vmem:[#allocation2 + $0x30] sm:$0xff]   ;;  %v807_v11 = vld [vmem:[#allocation2 + $0x68] sm:$0xff]   ;;  %vm916_vm4 = vmmov 0   ;;  %s917_s22 = smov [#allocation7]  }
  0x20   :  { %711 = vmatprep.subr.bf16.mxu1 %v803_v7  ;;  %v798_v12 = vld [vmem:[%s1041_s2 + $0x18] sm:$0xff]   ;;  %v799_v13 = vld [vmem:[%s1041_s2 + $0x10] sm:$0xff]   ;;  %v808_v14 = vld [vmem:[#allocation2 + $0x28] sm:$0xff]   ;;  %s643_s23 = sshll.u32 %s917_s22, 4  ;;  %s644_s23 = int_to_ptr.vmem [resolvable:$true] %s643_s23 }
  0x21   :  { %712 = vmatpush3.bf16.msra.mxu1 %v804_v8  ;;  %v809_v15 = vld [vmem:[#allocation2 + $0x60] sm:$0xff]   ;;  %v800_v17 = vld [vmem:[%s1041_s2 + $0x8] sm:$0xff]   ;;  %v811_v19 = vld [vmem:[#allocation2 + $0x58] sm:$0xff]   ;;  %p888_p11 = scmp.lt.s32.totalorder %s644_s23, %s644_s23 }
  0x22   :  { %146 = vmatpush1.bf16.msra.mxu0 %v795_v3  ;;  %713 = vmatprep.subr.bf16.mxu1 %v805_v9  ;;  %v802_v16 = vld [vmem:[%s1041_s2 + $0x40] ss:$0 sps:$4 sm:$0xff]   ;;  %v812_v21 = vld [vmem:[#allocation2 + $0x18] sm:$0xff]   ;;  %v813_v22 = vld [vmem:[#allocation2 + $0x50] sm:$0xff]  }
  0x23   :  { %147 = vmatprep.subr.bf16.mxu0 %v913_v0  ;;  %v810_v18 = vld [vmem:[#allocation2 + $0x20] sm:$0xff]   ;;  %v141_v20 = vsel %vm139_vm1, %v802_v16, 0  ;;  %v814_v24 = vld [vmem:[#allocation2 + $0x10] sm:$0xff]   ;;  %v815_v25 = vld [vmem:[#allocation2 + $0x48] sm:$0xff]  }
  0x24   :  { %v801_v23 = vld [vmem:[%s1041_s2] sm:$0xff]   ;;  %v816_v26 = vld [vmem:[#allocation2 + $0x8] sm:$0xff]   ;;  %v819_v34 = vld [vmem:[#allocation5 + $0x78] sm:$0xff]  }
  0x25   :  { %714 = vmatpush3.bf16.msra.mxu1 %v806_v10  ;;  %v817_v32 = vld [vmem:[#allocation2 + $0x40] sm:$0xff]   ;;  %v820_v38 = vld [vmem:[#allocation5 + $0x38] sm:$0xff]   ;;  %v821_v40 = vld [vmem:[#allocation5 + $0x70] sm:$0xff]  }
  0x26   :  { %148 = vmatpush1.bf16.msra.mxu0 %v796_v4  ;;  %715 = vmatprep.subr.bf16.mxu1 %v807_v11  ;;  %v818_v33 = vld [vmem:[#allocation2] sm:$0xff]   ;;  %v822_v43 = vld [vmem:[#allocation5 + $0x30] sm:$0xff]   ;;  %v823_v44 = vld [vmem:[#allocation5 + $0x68] sm:$0xff]  }
  0x27   :  { %149 = vmatprep.subr.bf16.mxu0 %v913_v0  ;;  %v824_v45 = vld [vmem:[#allocation5 + $0x28] sm:$0xff]   ;;  %v825_v46 = vld [vmem:[#allocation5 + $0x60] sm:$0xff]   ;;  %v827_v48 = vld [vmem:[#allocation5 + $0x58] sm:$0xff]  }
  0x28   :  { %v826_v47 = vld [vmem:[#allocation5 + $0x20] sm:$0xff]   ;;  %v828_v49 = vld [vmem:[#allocation5 + $0x18] sm:$0xff]   ;;  %v829_v50 = vld [vmem:[#allocation5 + $0x50] sm:$0xff]  }
  0x29   :  { %716 = vmatpush3.bf16.msra.mxu1 %v808_v14  ;;  %v830_v51 = vld [vmem:[#allocation5 + $0x10] sm:$0xff]   ;;  %v831_v52 = vld [vmem:[#allocation5 + $0x48] sm:$0xff]   ;;  %v833_v54 = vld [vmem:[#allocation5 + $0x40] sm:$0xff]  }
  0x2a   :  { %150 = vmatpush1.bf16.msra.mxu0 %v797_v5  ;;  %717 = vmatprep.subr.bf16.mxu1 %v809_v15  ;;  %v832_v53 = vld [vmem:[#allocation5 + $0x8] sm:$0xff]   ;;  %v834_v55 = vld [vmem:[#allocation5] sm:$0xff]   ;;  %v835_v56 = vld [vmem:[%s1044_s5 + $0x38] sm:$0xff]  }
  0x2b   :  { %151 = vmatprep.subr.bf16.mxu0 %v913_v0  ;;  %v836_v58 = vld [vmem:[%s1044_s5 + $0x30] sm:$0xff]   ;;  %v837_v59 = vld [vmem:[%s1044_s5 + $0x28] sm:$0xff]   ;;  %v838_v60 = vld [vmem:[%s1044_s5 + $0x20] sm:$0xff]  }
  0x2c   :  { %v839_v61 = vld [vmem:[%s1044_s5 + $0x18] sm:$0xff]   ;;  %v840_v62 = vld [vmem:[%s1044_s5 + $0x10] sm:$0xff]   ;;  %v841_v6 = vld [vmem:[%s1044_s5 + $0x8] sm:$0xff]  }
  0x2d   :  { %718 = vmatpush3.bf16.msra.mxu1 %v810_v18  ;;  %v842_v7 = vld [vmem:[%s1044_s5] sm:$0xff]   ;;  %s883_s5 = scalar_lea.vmem %s644_s23, 128 }
  0x2e   :  { %152 = vmatpush1.bf16.msra.mxu0 %v798_v12  ;;  %719 = vmatprep.subr.bf16.mxu1 %v811_v19  ;;  %v702_v15 = vld [vmem:[%s1045_s6] ss:$0 sm:$0xff]  ;;  %p884_p10 = scmp.ne.s32.totalorder %s644_s23, %s883_s5  ;;  %p889_p12 = scmp.lt.s32.totalorder %s883_s5, %s883_s5 }
  0x2f   :  { %153 = vmatprep.subr.bf16.mxu0 %v913_v0 }
  0x30   :  { %p890_p13 = por %p889_p12, %p888_p11 }
  0x31   :  { %720 = vmatpush3.bf16.msra.mxu1 %v812_v21 }
  0x32   :  { %154 = vmatpush1.bf16.msra.mxu0 %v799_v13  ;;  %721 = vmatprep.subr.bf16.mxu1 %v813_v22  ;;  %p891_p0 = pnand %p890_p13, %p884_p10 }
  0x33   :  { %155 = vmatprep.subr.bf16.mxu0 %v913_v0 }
  0x35   :  { %722 = vmatpush3.bf16.msra.mxu1 %v814_v24 }
  0x36   :  { %156 = vmatpush1.bf16.msra.mxu0 %v800_v17  ;;  %723 = vmatprep.subr.bf16.mxu1 %v815_v25 }
  0x37   :  { %157 = vmatprep.subr.bf16.mxu0 %v913_v0 }
  0x39   :  { %724 = vmatpush3.bf16.msra.mxu1 %v816_v26 }
  0x3a   :  { %158 = vmatpush1.bf16.msra.mxu0 %v801_v23  ;;  %725 = vmatprep.subr.bf16.mxu1 %v817_v32 }
  0x3b   :  { %173 = vmatprep.subr.bf16.mxu0 %v913_v0 }
  0x3d   :  { %726 = vmatpush3.bf16.msra.mxu1 %v818_v33 }
  0x3e   :  { %174 = vmatpush2.bf16.msra.mxu0 %v141_v20  ;;  %733 = vmatprep.subr.bf16.mxu1 %v819_v34 }
  0x3f   :  { %764 = vmatprep.subr.bf16.mxu0 %v915_v57 }
  0x99   :  { %v62_v29 = vpop.permute.xlu0 %61 }
  0x9a   :  { %vm63_vm2 = vcmp.eq.s32.totalorder %v59_v28, %v62_v29 }
  0x9b   :  { %vm998_vm3 = vmpackc.low %vm63_vm2, %vm63_vm2 }
  0x9c   :  { %665 = vmatmul.mubr.msk.bf16.vlgmr.msra.gmra.mxu0 %vm998_vm3, %v914_v31  ;;  %683 = vmatprep.mubr.msk.bf16.mxu1 %vm998_vm3, %v914_v31 }
  0x9d   :  { %765 = vmatpush3.bf16.msra.mxu0 %v835_v56  ;;  %780 = vmatprep.mubr.msk.bf16.mxu0 %vm916_vm4, %v915_v57 }
  0x9e   :  { %766 = vmatprep.subr.bf16.mxu0 %v915_v57 }
  0xa1   :  { %767 = vmatpush3.bf16.msra.mxu0 %v836_v58 }
  0xa2   :  { %768 = vmatprep.subr.bf16.mxu0 %v915_v57 }
  0xa5   :  { %769 = vmatpush3.bf16.msra.mxu0 %v837_v59 }
  0xa6   :  { %770 = vmatprep.subr.bf16.mxu0 %v915_v57 }
  0xa9   :  { %771 = vmatpush3.bf16.msra.mxu0 %v838_v60 }
  0xaa   :  { %772 = vmatprep.subr.bf16.mxu0 %v915_v57 }
  0xad   :  { %773 = vmatpush3.bf16.msra.mxu0 %v839_v61 }
  0xae   :  { %774 = vmatprep.subr.bf16.mxu0 %v915_v57 }
  0xb1   :  { %775 = vmatpush3.bf16.msra.mxu0 %v840_v62 }
  0xb2   :  { %776 = vmatprep.subr.bf16.mxu0 %v915_v57 }
  0xb5   :  { %777 = vmatpush3.bf16.msra.mxu0 %v841_v6 }
  0xb6   :  { %778 = vmatprep.subr.bf16.mxu0 %v915_v57 }
  0xb9   :  { %779 = vmatpush3.bf16.msra.mxu0 %v842_v7 }
 0x15c   :  { %v177_v35 = vpop.f32.mrf.mxu0 }
 0x15d   :  { %v183_v36 = vmax.f32 %v177_v35, 0.0 }
 0x15e   :  { %v179_v37 = vpop.f32.mrf.mxu0 }
 0x15f   :  { %v184_v39 = vpack.c.bf16 %v183_v36, %v183_v36 }
 0x160   :  { %v180_v41 = vpop.f32.mrf.mxu0 }
 0x161   :  { %346 = vmatmul.mubr.bf16.vlgmr.msra.gmra.mxu1 %v184_v39 }
 0x162   :  { %v181_v42 = vpop.f32.mrf.mxu0  ;;  %701 = vmatprep.mubr.msk.bf16.mxu1 %vm998_vm3, %v914_v31  ;;  %734 = vmatpush3.bf16.msra.mxu1 %v820_v38 }
 0x163   :  { %735 = vmatprep.subr.bf16.mxu1 %v821_v40 }
 0x166   :  { %736 = vmatpush3.bf16.msra.mxu1 %v822_v43 }
 0x167   :  { %737 = vmatprep.subr.bf16.mxu1 %v823_v44 }
 0x16a   :  { %738 = vmatpush3.bf16.msra.mxu1 %v824_v45 }
 0x16b   :  { %739 = vmatprep.subr.bf16.mxu1 %v825_v46 }
 0x16e   :  { %740 = vmatpush3.bf16.msra.mxu1 %v826_v47 }
 0x16f   :  { %741 = vmatprep.subr.bf16.mxu1 %v827_v48 }
 0x172   :  { %742 = vmatpush3.bf16.msra.mxu1 %v828_v49 }
 0x173   :  { %743 = vmatprep.subr.bf16.mxu1 %v829_v50 }
 0x176   :  { %744 = vmatpush3.bf16.msra.mxu1 %v830_v51 }
 0x177   :  { %745 = vmatprep.subr.bf16.mxu1 %v831_v52 }
 0x17a   :  { %746 = vmatpush3.bf16.msra.mxu1 %v832_v53 }
 0x17b   :  { %747 = vmatprep.subr.bf16.mxu1 %v833_v54 }
 0x17e   :  { %748 = vmatpush3.bf16.msra.mxu1 %v834_v55 }
 0x221   :  { %v727_v63 = vpop.f32.mrf.mxu1 }
 0x223   :  { %v728_v0 = vpop.f32.mrf.mxu1 }
 0x224   :  { %v729_v1 = vadd.f32 %v728_v0, %v727_v63 }
 0x225   :  { %v730_v2 = vpop.f32.mrf.mxu1 }
 0x226   :  { %v353_v3 = vmax.f32 %v729_v1, 0.0 }
 0x227   :  { %v731_v4 = vpop.f32.mrf.mxu1 }
 0x228   :  { %v354_v5 = vpack.c.bf16 %v353_v3, %v353_v3 }
 0x22a   :  { %516 = vmatmul.mubr.bf16.vlgmr.msra.gmra.mxu1 %v354_v5 }
 0x2ea   :  { %v749_v8 = vpop.f32.mrf.mxu1 }
 0x2ec   :  { %v750_v9 = vpop.f32.mrf.mxu1 }
 0x2ed   :  { %v751_v10 = vadd.f32 %v750_v9, %v749_v8 }
 0x2ee   :  { %v752_v11 = vpop.f32.mrf.mxu1 }
 0x2ef   :  { %v523_v12 = vmax.f32 %v751_v10, 0.0 }
 0x2f0   :  { %v753_v13 = vpop.f32.mrf.mxu1 }
 0x2f1   :  { %v524_v14 = vpack.c.bf16 %v523_v12, %v523_v12 }
 0x2f3   :  { %781 = vmatmul.mubr.bf16.vlgmr.msra.gmra.mxu0 %v524_v14 }
 0x3b3   :  { %v630_v16 = vpop.f32.mrf.mxu0 }
 0x3b4   :  { %v631_v17 = vadd.f32 %v702_v15, %v630_v16 }
 0x3b5   :  { %v782_v18 = vpop.f32.mrf.mxu0 }
 0x3b6   :  { %636 = vst.msk [vmem:[#allocation7] sm:$0xff] %vm135_vm0, %v631_v17 }
 0x3b7   :  { %v633_v19 = vpop.f32.mrf.mxu0 }
 0x3b8   :  { %894 = shalt.err (!%p891_p0)
}
 0x3b9   :  { %646 = dma.vmem_to_hbm [thread:$0]  %s644_s23, 128, %s1046_s7, [#allocation4]   ;;  %v783_v20 = vpop.f32.mrf.mxu0 }
 0x3ba   :  { %907 = dma.done.wait [#allocation4], 128  }
 0x3bb   :  { %908 = vsyncadd [#allocation4], 4294967168 }
 0x3bc   :  { %650 = vsyncpa [#allocation3], 1 }
 0x3bd   :  { %651 = vsyncpa [#allocation6], 1 }
 0x3be   :  { %652 = vsyncpa [#allocation4], 1 }

</bundles_post_ra>
